<compile_context>
chip_gen: v5e
topology: v5e:2x2
jax: 0.10.0
libtpu: 0.0.40
codegen_flags: <defaults>
</compile_context>

<pallas_src>
import jax
import jax.numpy as jnp
from jax.experimental import pallas as pl
from jax.experimental.pallas import tpu as pltpu


# ---------------------------------------------------------------------------
# Pallas kernel.  Per (image n, token tile t):
#   g, x : (Cg, T), (Cx, T)          tokens on the lane axis (bf16 or f32)
#   h    : relu(Wg_t @ g + Wx_t @ x + b_gx)        (F_int, T)  f32, MXU
#   p    : sigmoid(sum_c(h * wp_col) + bp)         (1, T)      VPU/XLU/EUP
#   out  : x * p                                   (Cx, T)     lane-dense store
# ---------------------------------------------------------------------------
def _attention_block_kernel(g_ref, x_ref, wg_ref, wx_ref, bgx_ref, wp_ref,
                            bp_ref, o_ref):
    g = g_ref[...]                         # (Cg, T)  MXU operand (bf16/f32)
    x = x_ref[...]                         # (Cx, T)

    # Fused gating 1x1 convs + folded BN.  Both MXU products accumulate into
    # one f32 (F_int, T) result; single pre-summed bias row broadcasts over the
    # lane axis.  (The dot+dot add is expected to fuse into the MXU result
    # buffer; the kernel is HBM-bound either way.)
    h = (jnp.dot(wg_ref[...], g, preferred_element_type=jnp.float32)
         + jnp.dot(wx_ref[...], x, preferred_element_type=jnp.float32)
         + bgx_ref[...])                   # (F_int, T) f32
    h = jnp.maximum(h, 0.0)                # ReLU (VPU)

    # psi 1x1 conv (Cout=1) as multiply + cross-sublane reduction (VPU/XLU);
    # exp and the approximate reciprocal both ride the EUP slot.
    p = jnp.sum(h * wp_ref[...], axis=0, keepdims=True) + bp_ref[0]   # (1, T)
    p = pl.reciprocal(1.0 + jnp.exp(-p), approx=True)                 # sigmoid

    o_ref[...] = (x.astype(jnp.float32) * p).astype(o_ref.dtype)


# ---------------------------------------------------------------------------
# Tile selection: lane-dense (multiple of 128, or the full row), balanced
# tails, per-step VMEM budget respected, >=2 grid steps when N == 1 (v7x).
# ---------------------------------------------------------------------------
def _cdiv(a, b):
    return -(-a // b)


def _round_up(a, m):
    return _cdiv(a, m) * m


def _choose_tile(T, N, per_token_bytes, *, max_tile=8192, vmem_budget=20 << 20):
    cap = min(max_tile, max(vmem_budget // max(per_token_bytes, 1), 128))
    cap = max((cap // 128) * 128, 128)
    min_tiles = 2 if N == 1 else 1         # keep both v7x TensorCores busy
    if T <= cap and min_tiles == 1:
        return T                           # whole row: always a legal block
    num = max(_cdiv(T, cap), min_tiles)
    if T < 128 * num:                      # cannot split into 128-wide tiles
        return T
    return _round_up(_cdiv(T, num), 128)   # balanced, lane-dense tiles


def attention_block_pallas(g3, x3, wg_t, wx_t, bgx, wp_col, bp, *,
                           max_tile=8192, vmem_budget=20 << 20):
    """g3: (N, Cg, T), x3: (N, Cx, T); weights already BN-folded & transposed."""
    N, Cg, T = g3.shape
    Cx = x3.shape[1]
    F_int = wg_t.shape[0]
    g_bytes = jnp.dtype(g3.dtype).itemsize
    x_bytes = jnp.dtype(x3.dtype).itemsize

    # Per-token VMEM footprint: double-buffered g/x/out token blocks plus
    # headroom for two f32 (F_int, tile) intermediates.
    per_token = 2 * (Cg * g_bytes + 2 * Cx * x_bytes) + 8 * F_int
    tile = _choose_tile(T, N, per_token, max_tile=max_tile,
                        vmem_budget=vmem_budget)
    grid = (N, _cdiv(T, tile))

    weight_bytes = (wg_t.size * jnp.dtype(wg_t.dtype).itemsize
                    + wx_t.size * jnp.dtype(wx_t.dtype).itemsize
                    + (bgx.size + wp_col.size + bp.size) * 4)
    est_vmem = per_token * tile + 2 * weight_bytes
    # Raise v5e's 16 MiB scoped default; stay well inside v7x's 64 MiB physical.
    vmem_limit = int(min(max(2 * est_vmem, 32 << 20), 40 << 20))

    cost = pl.CostEstimate(
        flops=int(N * T * (2 * (Cg + Cx) * F_int + 3 * F_int + 2 * Cx + 4)),
        transcendentals=int(2 * N * T),
        bytes_accessed=int(N * T * (Cg * g_bytes + 2 * Cx * x_bytes)
                           + weight_bytes))

    def tok_spec(C):
        # Leading batch dim squeezed: kernel sees a (C, tile) ref.
        return pl.BlockSpec((None, C, tile), lambda n, t: (n, 0, t))

    def w_spec(shape):
        return pl.BlockSpec(shape, lambda n, t: (0, 0))

    return pl.pallas_call(
        _attention_block_kernel,
        out_shape=jax.ShapeDtypeStruct((N, Cx, T), x3.dtype),
        grid_spec=pltpu.PrefetchScalarGridSpec(
            num_scalar_prefetch=0,
            grid=grid,
            in_specs=[
                tok_spec(Cg),                       # g tokens
                tok_spec(Cx),                       # x tokens
                w_spec((F_int, Cg)),                # Wg^T  (BN-folded, bf16)
                w_spec((F_int, Cx)),                # Wx^T  (BN-folded, bf16)
                w_spec((F_int, 1)),                 # bg+bx (pre-summed, f32)
                w_spec((F_int, 1)),                 # psi weight column (f32)
                pl.BlockSpec(memory_space=pltpu.MemorySpace.SMEM),  # psi bias
            ],
            out_specs=tok_spec(Cx),
        ),
        compiler_params=pltpu.CompilerParams(
            dimension_semantics=("parallel", "parallel"),
            vmem_limit_bytes=vmem_limit),
        cost_estimate=cost,
    )(g3, x3, wg_t, wx_t, bgx, wp_col, bp)


# ---------------------------------------------------------------------------
# Glue: parameter init (PyTorch shapes), BN folding, layout handling
# ---------------------------------------------------------------------------
def make_params(key, F_g, F_l, F_int, eps=1e-5, weight_dtype=jnp.bfloat16):
    """Build PyTorch-style conv/BN params and fold BN (inference) into them.

    Matches the PyTorch module:
      W_g : Conv2d(F_l -> F_int) + BN, applied to g   (g has F_l channels)
      W_x : Conv2d(F_g -> F_int) + BN, applied to x   (x has F_g channels)
      psi : Conv2d(F_int -> 1)   + BN + Sigmoid
    Returns weights in the kernel's (Cout, Cin) / column orientation; the two
    MXU weights are cast to `weight_dtype` (bf16), biases/psi column stay f32.
    """
    ks = jax.random.split(key, 6)
    wg = jax.random.normal(ks[0], (F_int, F_l), jnp.float32) * 0.1
    bg = jax.random.normal(ks[1], (F_int,), jnp.float32) * 0.1
    wx = jax.random.normal(ks[2], (F_int, F_g), jnp.float32) * 0.1
    bx = jax.random.normal(ks[3], (F_int,), jnp.float32) * 0.1
    wp = jax.random.normal(ks[4], (1, F_int), jnp.float32) * 0.1
    bp = jax.random.normal(ks[5], (1,), jnp.float32) * 0.1

    def bn(c, offset):   # deterministic, non-trivial inference-mode BN stats
        gamma = 1.0 + 0.05 * jnp.arange(c, dtype=jnp.float32)
        beta = 0.02 * jnp.arange(c, dtype=jnp.float32) - 0.01
        mean = 0.03 * jnp.arange(c, dtype=jnp.float32) + offset
        var = 1.0 + 0.1 * jnp.arange(c, dtype=jnp.float32)
        return gamma, beta, mean, var

    def fold(w, b, gamma, beta, mean, var):     # w: (Cout, Cin)
        scale = gamma / jnp.sqrt(var + eps)     # (Cout,)
        return w * scale[:, None], (b - mean) * scale + beta

    wg_f, bg_f = fold(wg, bg, *bn(F_int, 0.00))
    wx_f, bx_f = fold(wx, bx, *bn(F_int, 0.01))
    wp_f, bp_f = fold(wp, bp, *bn(1, 0.02))

    return (wg_f.astype(weight_dtype),                           # (F_int, F_l)
            wx_f.astype(weight_dtype),                           # (F_int, F_g)
            (bg_f + bx_f).reshape(F_int, 1).astype(jnp.float32),  # summed bias
            wp_f.reshape(F_int, 1).astype(jnp.float32),           # psi column
            bp_f.reshape(1,).astype(jnp.float32))                 # psi bias


def attention_block(g_nchw, x_nchw, params, *, max_tile=8192,
                    vmem_budget=20 << 20):
    """NCHW in / NCHW out; only free reshapes (no transposes) in the wrapper."""
    wg_t, wx_t, bgx, wp_col, bp = params
    N, Cx, H, W = x_nchw.shape
    Cg = g_nchw.shape[1]
    T = H * W
    g3 = g_nchw.reshape(N, Cg, T)
    x3 = x_nchw.reshape(N, Cx, T)
    out3 = attention_block_pallas(g3, x3, wg_t, wx_t, bgx, wp_col, bp,
                                  max_tile=max_tile, vmem_budget=vmem_budget)
    return out3.reshape(N, Cx, H, W)


def attention_block_reference(g_nchw, x_nchw, params):
    """Pure-JAX f32 reference of the same (BN-folded, inference) computation."""
    wg_t, wx_t, bgx, wp_col, bp = params
    N, Cx, H, W = x_nchw.shape
    Cg = g_nchw.shape[1]
    g3 = g_nchw.reshape(N, Cg, H * W).astype(jnp.float32)
    x3 = x_nchw.reshape(N, Cx, H * W).astype(jnp.float32)
    h = (jnp.einsum('oc,nct->not', wg_t.astype(jnp.float32), g3)
         + jnp.einsum('oc,nct->not', wx_t.astype(jnp.float32), x3)
         + bgx[None])
    h = jnp.maximum(h, 0.0)
    p = jnp.sum(h * wp_col[None], axis=1, keepdims=True) + bp[0]
    p = 1.0 / (1.0 + jnp.exp(-p))
    out = x3 * p
    return out.reshape(N, Cx, H, W)


if __name__ == "__main__":
    # F_g != F_l on purpose, to exercise the weight/shape wiring of this module:
    # g carries F_l channels (input to W_g), x carries F_g channels (input to W_x).
    F_g = 4      # channels of x (and of the output)
    F_l = 8      # channels of g
    F_int = 32
    N, H, W = 2, 16, 16

    key = jax.random.PRNGKey(0)
    k_g, k_x, k_p = jax.random.split(key, 3)
    # bf16 activation I/O (kernel computes in f32 internally).
    g = jax.random.normal(k_g, (N, F_l, H, W), jnp.float32).astype(jnp.bfloat16)
    x = jax.random.normal(k_x, (N, F_g, H, W), jnp.float32).astype(jnp.bfloat16)

    params = make_params(k_p, F_g, F_l, F_int)

    out = jax.block_until_ready(attention_block(g, x, params))
    ref = attention_block_reference(g, x, params)

    assert out.shape == x.shape
    assert out.dtype == x.dtype
    max_err = float(jnp.max(jnp.abs(out.astype(jnp.float32) - ref)))
    assert max_err < 2e-2, f"mismatch vs reference: max abs err {max_err}"

    print("KERNEL_OK")
</pallas_src>

<mosaic_0001>
module attributes {stable_mosaic.version = 11 : i64} {
  func.func @_attention_block_kernel(%arg0: i32, %arg1: i32, %arg2: memref<1x8x256xbf16, #tpu.memory_space<vmem>>, %arg3: memref<1x4x256xbf16, #tpu.memory_space<vmem>>, %arg4: memref<32x8xbf16, #tpu.memory_space<vmem>>, %arg5: memref<32x4xbf16, #tpu.memory_space<vmem>>, %arg6: memref<32x1xf32, #tpu.memory_space<vmem>>, %arg7: memref<32x1xf32, #tpu.memory_space<vmem>>, %arg8: memref<1xf32, #tpu.memory_space<smem>>, %arg9: memref<1x4x256xbf16, #tpu.memory_space<vmem>>) attributes {dimension_semantics = [#tpu.dimension_semantics<parallel>, #tpu.dimension_semantics<parallel>], iteration_bounds = array<i64: 2, 1>, scalar_prefetch = 0 : i64, scratch_operands = 0 : i64, tpu.core_type = #tpu.core_type<tc>, window_params = [{transform_indices = @transform_0, window_bounds = array<i64: 1, 8, 256>}, {transform_indices = @transform_1, window_bounds = array<i64: 1, 4, 256>}, {pipeline_mode = #tpu.pipeline_mode<synchronous>, transform_indices = @transform_2, window_bounds = array<i64: 32, 8>}, {pipeline_mode = #tpu.pipeline_mode<synchronous>, transform_indices = @transform_3, window_bounds = array<i64: 32, 4>}, {pipeline_mode = #tpu.pipeline_mode<synchronous>, transform_indices = @transform_4, window_bounds = array<i64: 32, 1>}, {pipeline_mode = #tpu.pipeline_mode<synchronous>, transform_indices = @transform_5, window_bounds = array<i64: 32, 1>}, {transform_indices = @transform_6, window_bounds = array<i64: 1>}, {transform_indices = @transform_7, window_bounds = array<i64: 1, 4, 256>}]} {
    %c0 = arith.constant 0 : index
    %c0_0 = arith.constant 0 : index
    %c0_1 = arith.constant 0 : index
    %0 = vector.load %arg2[%c0, %c0_0, %c0_1] : memref<1x8x256xbf16, #tpu.memory_space<vmem>>, vector<1x8x256xbf16>
    %1 = vector.shape_cast %0 : vector<1x8x256xbf16> to vector<8x256xbf16>
    %c0_2 = arith.constant 0 : index
    %c0_3 = arith.constant 0 : index
    %c0_4 = arith.constant 0 : index
    %2 = vector.load %arg3[%c0_2, %c0_3, %c0_4] : memref<1x4x256xbf16, #tpu.memory_space<vmem>>, vector<1x4x256xbf16>
    %3 = vector.shape_cast %2 : vector<1x4x256xbf16> to vector<4x256xbf16>
    %c0_5 = arith.constant 0 : index
    %c0_6 = arith.constant 0 : index
    %4 = vector.load %arg4[%c0_5, %c0_6] : memref<32x8xbf16, #tpu.memory_space<vmem>>, vector<32x8xbf16>
    %cst = arith.constant dense<0.000000e+00> : vector<32x256xf32>
    %5 = tpu.matmul %4, %1, %cst {dimension_numbers = #tpu.dot_dimension_numbers<[1], [0], [0], [1], [0, 0, 1, 1], [], []>} : vector<32x8xbf16>, vector<8x256xbf16>, vector<32x256xf32> -> vector<32x256xf32>
    %c0_7 = arith.constant 0 : index
    %c0_8 = arith.constant 0 : index
    %6 = vector.load %arg5[%c0_7, %c0_8] : memref<32x4xbf16, #tpu.memory_space<vmem>>, vector<32x4xbf16>
    %cst_9 = arith.constant dense<0.000000e+00> : vector<32x256xf32>
    %7 = tpu.matmul %6, %3, %cst_9 {dimension_numbers = #tpu.dot_dimension_numbers<[1], [0], [0], [1], [0, 0, 1, 1], [], []>} : vector<32x4xbf16>, vector<4x256xbf16>, vector<32x256xf32> -> vector<32x256xf32>
    %8 = arith.addf %5, %7 : vector<32x256xf32>
    %c0_10 = arith.constant 0 : index
    %c0_11 = arith.constant 0 : index
    %9 = vector.load %arg6[%c0_10, %c0_11] : memref<32x1xf32, #tpu.memory_space<vmem>>, vector<32x1xf32>
    %10 = vector.broadcast %9 : vector<32x1xf32> to vector<32x256xf32>
    %11 = arith.addf %8, %10 : vector<32x256xf32>
    %cst_12 = arith.constant 0.000000e+00 : f32
    %12 = vector.broadcast %cst_12 : f32 to vector<32x256xf32>
    %13 = arith.maximumf %11, %12 : vector<32x256xf32>
    %c0_13 = arith.constant 0 : index
    %c0_14 = arith.constant 0 : index
    %14 = vector.load %arg7[%c0_13, %c0_14] : memref<32x1xf32, #tpu.memory_space<vmem>>, vector<32x1xf32>
    %15 = vector.broadcast %14 : vector<32x1xf32> to vector<32x256xf32>
    %16 = arith.mulf %13, %15 : vector<32x256xf32>
    %cst_15 = arith.constant dense<0.000000e+00> : vector<256xf32>
    %17 = vector.multi_reduction <add>, %16, %cst_15 [0] : vector<32x256xf32> to vector<256xf32>
    %18 = vector.shape_cast %17 : vector<256xf32> to vector<1x256xf32>
    %c0_16 = arith.constant 0 : index
    %19 = memref.load %arg8[%c0_16] : memref<1xf32, #tpu.memory_space<smem>>
    %20 = vector.broadcast %19 : f32 to vector<1x256xf32>
    %21 = arith.addf %18, %20 : vector<1x256xf32>
    %cst_17 = arith.constant 0.000000e+00 : f32
    %22 = vector.broadcast %cst_17 : f32 to vector<1x256xf32>
    %23 = arith.subf %22, %21 : vector<1x256xf32>
    %24 = math.exp %23 : vector<1x256xf32>
    %cst_18 = arith.constant 1.000000e+00 : f32
    %25 = vector.broadcast %cst_18 : f32 to vector<1x256xf32>
    %26 = arith.addf %25, %24 : vector<1x256xf32>
    %27 = tpu.reciprocal %26 {approx = true} : vector<1x256xf32> -> vector<1x256xf32>
    %28 = arith.extf %3 : vector<4x256xbf16> to vector<4x256xf32>
    %29 = vector.broadcast %27 : vector<1x256xf32> to vector<4x256xf32>
    %30 = arith.mulf %28, %29 : vector<4x256xf32>
    %31 = arith.truncf %30 : vector<4x256xf32> to vector<4x256xbf16>
    %c0_19 = arith.constant 0 : index
    %c0_20 = arith.constant 0 : index
    %c0_21 = arith.constant 0 : index
    %32 = vector.load %arg9[%c0_19, %c0_20, %c0_21] : memref<1x4x256xbf16, #tpu.memory_space<vmem>>, vector<1x4x256xbf16>
    %33 = vector.shape_cast %32 : vector<1x4x256xbf16> to vector<4x256xbf16>
    %34 = vector.shape_cast %31 : vector<4x256xbf16> to vector<1x4x256xbf16>
    tpu.vector_store %arg9[%c0_19, %c0_20, %c0_21], %34 {strides = array<i32>} : memref<1x4x256xbf16, #tpu.memory_space<vmem>>, vector<1x4x256xbf16>,
    return
  }
  func.func @transform_0(%arg0: i32, %arg1: i32) -> (i32, i32, i32) {
    %c0_i32 = arith.constant 0 : i32
    %c0_i32_0 = arith.constant 0 : i32
    return %arg0, %c0_i32, %arg1 : i32, i32, i32
  }
  func.func @transform_1(%arg0: i32, %arg1: i32) -> (i32, i32, i32) {
    %c0_i32 = arith.constant 0 : i32
    %c0_i32_0 = arith.constant 0 : i32
    return %arg0, %c0_i32, %arg1 : i32, i32, i32
  }
  func.func @transform_2(%arg0: i32, %arg1: i32) -> (i32, i32) {
    %c0_i32 = arith.constant 0 : i32
    %c0_i32_0 = arith.constant 0 : i32
    %c0_i32_1 = arith.constant 0 : i32
    return %c0_i32, %c0_i32_0 : i32, i32
  }
  func.func @transform_3(%arg0: i32, %arg1: i32) -> (i32, i32) {
    %c0_i32 = arith.constant 0 : i32
    %c0_i32_0 = arith.constant 0 : i32
    %c0_i32_1 = arith.constant 0 : i32
    return %c0_i32, %c0_i32_0 : i32, i32
  }
  func.func @transform_4(%arg0: i32, %arg1: i32) -> (i32, i32) {
    %c0_i32 = arith.constant 0 : i32
    %c0_i32_0 = arith.constant 0 : i32
    %c0_i32_1 = arith.constant 0 : i32
    return %c0_i32, %c0_i32_0 : i32, i32
  }
  func.func @transform_5(%arg0: i32, %arg1: i32) -> (i32, i32) {
    %c0_i32 = arith.constant 0 : i32
    %c0_i32_0 = arith.constant 0 : i32
    %c0_i32_1 = arith.constant 0 : i32
    return %c0_i32, %c0_i32_0 : i32, i32
  }
  func.func @transform_6(%arg0: i32, %arg1: i32) -> i32 {
    %c0_i32 = arith.constant 0 : i32
    %c0_i32_0 = arith.constant 0 : i32
    return %c0_i32 : i32
  }
  func.func @transform_7(%arg0: i32, %arg1: i32) -> (i32, i32, i32) {
    %c0_i32 = arith.constant 0 : i32
    %c0_i32_0 = arith.constant 0 : i32
    return %arg0, %c0_i32, %arg1 : i32, i32, i32
  }
}

</mosaic_0001>

<bundles_post_ra>
// kernel: tpu_custom_call.1
= control target key start
LH: loop header
LB: loop body
LE: loop exit
PB: predicated region body
PF: predicated region fallthrough
CT: control target
= control target key end

     0   :  { %s1112_s0 = inlined_call_operand.vmem [shape: bf16[2,8,256], index: 0, kind: input, shape index: {}]   ;;  %s1113_s1 = inlined_call_operand.vmem [shape: bf16[2,4,256], index: 1, kind: input, shape index: {}]   ;;  %s1114_s2 = inlined_call_operand.vmem [shape: bf16[32,8], index: 2, kind: input, shape index: {}]   ;;  %s1115_s3 = inlined_call_operand.vmem [shape: bf16[32,4], index: 3, kind: input, shape index: {}]   ;;  %s1116_s4 = inlined_call_operand.vmem [shape: f32[32,1], index: 4, kind: input, shape index: {}]   ;;  %s1117_s5 = inlined_call_operand.vmem [shape: f32[32,1], index: 5, kind: input, shape index: {}]   ;;  %s1118_s6 = inlined_call_operand.<no memory space> [shape: f32[1], index: 6, kind: input, shape index: {}]   ;;  %s1119_s7 = inlined_call_operand.hbm [shape: bf16[2,4,256], index: 7, kind: output, shape index: {}]  }
   0x1   :  { %12 = sst [smem:[#allocation2]] %s1118_s6 }
   0x2   :  { %13 = vsyncpa [#allocation4], 0 }
   0x3   :  { %15 = vsyncpa [#allocation4 + $0x1], 0  ;;  %s962_s26 = smov 0   ;;  %s964_s27 = smov 0  }
   0x4   :  { %s966_s28 = smov 0   ;;  %s968_s29 = smov 0  }
   0x5   :  { %s970_s30 = smov 0   ;;  %s972_s8 = smov 0  }
   0x6 LB: > { %s725_s6 = sadd.s32 4294967295, %s916_s8   ;;  %s726_s9 = sadd.s32 4294967294, %s916_s8   ;;  %s916_s8 = sphi %s972_s8, %s21_s8   ;;  %s912_s30 = sphi %s970_s30, %s1126_s30   ;;  %s908_s29 = sphi %s968_s29, %s1125_s29   ;;  %s904_s28 = sphi %s966_s28, %s1124_s28   ;;  %s900_s27 = sphi %s964_s27, %s1123_s27   ;;  %s896_s26 = sphi %s962_s26, %s1122_s26  }
   0x7   : > { %s33_s10 = sadd.s32 1, %s912_s30  ;;  %s203_s11 = sadd.s32 1, %s904_s28 }
   0x8   : > { %p35_p0 = scmp.ge.s32.totalorder %s33_s10, 2  ;;  %p213_p1 = scmp.ne.s32.totalorder %s904_s28, %s900_s27 }
   0x9   : > { %p214_p2 = scmp.eq.s32.totalorder %s725_s6, 1  ;;  %p219_p3 = scmp.ne.s32.totalorder %s900_s27, %s896_s26 }
   0xa   : > { %s1128_s10 = smov (%p35_p0, %s33_s10), 0  ;;  %p220_p5 = scmp.eq.s32.totalorder %s726_s9, 1 }
   0xb   : > { %p1002_p4 = por %p214_p2, %p213_p1  ;;  %s198_s13 = ssub.s32 %s912_s30, %s1128_s10 }
   0xc   : > { %p729_p6 = scmp.ge.s32.totalorder %s916_s8, 1  ;;  %p201_p7 = scmp.eq.s32.totalorder %s198_s13, 0 }
   0xd   : > { %p1009_p8 = por %p220_p5, %p219_p3  ;;  %p279_p9 = scmp.lt.s32.totalorder %s916_s8, 3 }
   0xe   : > { %s1015_s15 = scalar_select %p201_p7, %s904_s28, %s203_s11  }
   0xf   : > { %p280_p10 = pnand %p729_p6, %p279_p9 }
  0x10   : > { %p325_p11 = scmp.lt.s32.totalorder (!%p280_p10), %s908_s29, 1  ;;  %s770_s24 = sshll.u32 (!%p280_p10), %s908_s29, 2 }
  0x11   : > { %283 = sbr.rel (%p280_p10) target bundleno = 258 (0x102), region = 48 }
  0x16   : > { %v487_v0 = vld [vmem:[%s1116_s4] sm:$0xff]  ;;  %v489_v1 = vld [vmem:[%s1116_s4 + $0x10] sm:$0xff]  ;;  %s326_s20 = scalar_select %p325_p11, %s908_s29, 1  ;;  %v918_v2 = vmov 0   ;;  %vm442_vm0 = vcmask 1043456   ;;  %v488_v8 = vld [vmem:[%s1116_s4 + $0x8] sm:$0xff] }
  0x17   : > { %827 = vset.pattern.permute.xlu0 %v918_v2  ;;  %828 = vset.pattern.permute.xlu1 %v918_v2  ;;  %v527_v3 = vld [vmem:[%s1117_s5] sm:$0xff]  ;;  %v490_v9 = vld [vmem:[%s1116_s4 + $0x18] sm:$0xff]  ;;  %v528_v12 = vld [vmem:[%s1117_s5 + $0x8] sm:$0xff]  ;;  %vm435_vm1 = vcmask 64512   ;;  %vm377_vm2 = vcmask 1041408   ;;  %vm370_vm3 = vcmask 31744  }
  0x18   : > { %493 = vperm.xlu0 %827, %v487_v0   ;;  %503 = vperm.xlu1 %828, %v489_v1   ;;  %s764_s21 = sshll.u32 %s326_s20, 3  ;;  %s765_s22 = sshll.u32 %s326_s20, 2  ;;  %v766_v15 = vld [vmem:[%s1114_s2] sm:$0xff]  ;;  %v529_v21 = vld [vmem:[%s1117_s5 + $0x10] sm:$0xff]  ;;  %v530_v22 = vld [vmem:[%s1117_s5 + $0x18] sm:$0xff] }
  0x19   : > { %829 = vset.pattern.permute.xlu2 %v918_v2  ;;  %s332_s9 = scalar_lea.vmem %s1112_s0, %s764_s21  ;;  %s342_s16 = scalar_lea.vmem %s1113_s1, %s765_s22  ;;  %v768_v20 = vld [vmem:[%s1115_s3] sm:$0xff]  ;;  %v767_v23 = vld [vmem:[%s1114_s2 + $0x8] sm:$0xff] }
  0x1a   : > { %533 = vperm.xlu2 %829, %v527_v3   ;;  %v346_v4 = vld [vmem:[%s332_s9] sm:$0xff]  ;;  %v769_v24 = vld [vmem:[%s1115_s3 + $0x8] sm:$0xff]  ;;  %s577_s21 = sld [smem:[#allocation2]]  ;;  %s321_s22 = sand.u32 1, %s900_s27  }
  0x1b   : > { %v1034_v5 = vld [vmem:[%s342_s16] sm:$0xf]  ;;  %v431_v6 = vunpack.c.l.b16 %v346_v4  ;;  %v432_v7 = vunpack.c.h.b16 %v346_v4  ;;  %s730_s23 = sshll.u32 %s321_s22, 2  ;;  %s626_s9 = scalar_lea.hbm %s1119_s7, %s770_s24 }
  0x1c   : > { %367 = vst [vmem:[#allocation1] ss:$4 sm:$0xff] %v1034_v5  ;;  %s323_s11 = scalar_lea.vmem [#allocation3], %s730_s23  ;;  %s630_s16 = sshll.u32 %s626_s9, 4  ;;  %s631_s16 = int_to_ptr.hbm [resolvable:$true] %s630_s16 }
  0x1d   : > { %v433_v10 = vpack.c.b16 %v431_v6, %v431_v6  ;;  %v434_v11 = vpack.c.b16 %v432_v7, %v432_v7  ;;  %s628_s13 = sshll.u32 %s323_s11, 4  ;;  %s613_s17 = scalar_lea.sflag [#allocation4], %s321_s22  ;;  %s629_s13 = int_to_ptr.vmem [resolvable:$true] %s628_s13 }
  0x1e   : > { %s852_s18 = sshra.s32 %s631_s16, 4  ;;  %s853_s18 = int_to_ptr.hbm [resolvable:$true] %s852_s18 }
  0x1f   : > { %v444_v13 = vsel %vm442_vm0, %v433_v10, 0  ;;  %v447_v14 = vsel %vm442_vm0, %v434_v11, 0  ;;  %s854_s29 = scalar_lea.hbm %s853_s18, 4  ;;  %p859_p1 = scmp.lt.s32.totalorder %s853_s18, %s1119_s7 }
  0x20   : > { %498 = vperm.xlu0 %827, %v488_v8   ;;  %508 = vperm.xlu1 %828, %v490_v9   ;;  %p855_p12 = scmp.ne.s32.totalorder %s853_s18, %s854_s29 }
  0x21   : > { %456 = vmatpush.bf16.msra.mxu2 %v444_v13  ;;  %475 = vmatpush.bf16.msra.mxu3 %v447_v14 }
  0x22   : > { %538 = vperm.xlu2 %829, %v528_v12   ;;  %p856_p13 = pnand %p855_p12, %p1002_p4 }
  0x23   : > { %v368_v16 = vld.sshfl [vmem:[#allocation1] sm:$0xff pattern:$0x73625140]  ;;  %v369_v17 = vld.sshfl [vmem:[#allocation1 + $0x8] sm:$0xff pattern:$0x73625140] }
  0x24   : > { %755 = vmatmul.msk.bf16.vlgmr.msra.gmra.mxu2 %vm435_vm1, %v766_v15  ;;  %757 = vmatmul.msk.bf16.vlgmr.msra.gmra.mxu3 %vm435_vm1, %v766_v15  ;;  %v378_v18 = vsel %vm377_vm2, %v368_v16, 0  ;;  %v380_v19 = vsel %vm377_vm2, %v369_v17, 0  ;;  %p857_p0 = pneg %p856_p13 }
  0x25   : > { %389 = vmatpush.bf16.msra.mxu0 %v378_v18  ;;  %408 = vmatpush.bf16.msra.mxu1 %v380_v19 }
  0x28   : > { %743 = vmatmul.msk.bf16.vlgmr.msra.gmra.mxu0 %vm370_vm3, %v768_v20  ;;  %745 = vmatmul.msk.bf16.vlgmr.msra.gmra.mxu1 %vm370_vm3, %v768_v20 }
  0x29   : > { %543 = vperm.xlu0 %827, %v529_v21   ;;  %548 = vperm.xlu1 %828, %v530_v22  }
  0x34   : > { %756 = vmatmul.msk.bf16.gmra.mxu2 %vm435_vm1, %v767_v23  ;;  %758 = vmatmul.msk.bf16.gmra.mxu3 %vm435_vm1, %v767_v23 }
  0x38   : > { %744 = vmatmul.msk.bf16.gmra.mxu0 %vm370_vm3, %v769_v24  ;;  %746 = vmatmul.msk.bf16.gmra.mxu1 %vm370_vm3, %v769_v24 }
  0x74   : > { %v534_v35 = vpop.permute.xlu2 %533 }
  0x7c   : > { %v539_v58 = vpop.permute.xlu2 %538 }
  0x8a   : > { %v494_v29 = vpop.permute.xlu0 %493  ;;  %v504_v34 = vpop.permute.xlu1 %503 }
  0x92   : > { %v499_v42 = vpop.permute.xlu0 %498  ;;  %v509_v53 = vpop.permute.xlu1 %508 }
  0x9b   : > { %v544_v8 = vpop.permute.xlu0 %543  ;;  %v549_v17 = vpop.permute.xlu1 %548 }
  0xa5   : > { %v391_v25 = vpop.f32.mrf.mxu0  ;;  %v410_v26 = vpop.f32.mrf.mxu1 }
  0xa7   : > { %v458_v27 = vpop.f32.mrf.mxu2  ;;  %v477_v28 = vpop.f32.mrf.mxu3 }
  0xa8   : > { %v459_v38 = vadd.f32 %v458_v27, %v391_v25  ;;  %v478_v39 = vadd.f32 %v477_v28, %v410_v26 }
  0xaa   : > { %v511_v49 = vadd.f32 %v494_v29, %v459_v38  ;;  %v512_v50 = vadd.f32 %v494_v29, %v478_v39 }
  0xac   : > { %v519_v56 = vmax.f32 %v511_v49, 0.0  ;;  %v520_v57 = vmax.f32 %v512_v50, 0.0 }
  0xad   : > { %v393_v30 = vpop.f32.mrf.mxu0  ;;  %v412_v31 = vpop.f32.mrf.mxu1 }
  0xae   : > { %v551_v6 = vmul.f32 %v534_v35, %v519_v56  ;;  %v552_v7 = vmul.f32 %v534_v35, %v520_v57 }
  0xaf   : > { %v460_v32 = vpop.f32.mrf.mxu2  ;;  %v479_v33 = vpop.f32.mrf.mxu3 }
  0xb0   : > { %v461_v36 = vadd.f32 %v460_v32, %v393_v30  ;;  %v480_v37 = vadd.f32 %v479_v33, %v412_v31 }
  0xb2   : > { %v513_v45 = vadd.f32 %v499_v42, %v461_v36  ;;  %v514_v46 = vadd.f32 %v499_v42, %v480_v37 }
  0xb4   : > { %v521_v54 = vmax.f32 %v513_v45, 0.0  ;;  %v522_v55 = vmax.f32 %v514_v46, 0.0 }
  0xb5   : > { %v396_v40 = vpop.f32.mrf.mxu0  ;;  %v415_v41 = vpop.f32.mrf.mxu1 }
  0xb6   : > { %v553_v1 = vmul.f32 %v539_v58, %v521_v54  ;;  %v554_v2 = vmul.f32 %v539_v58, %v522_v55 }
  0xb7   : > { %v463_v43 = vpop.f32.mrf.mxu2  ;;  %v482_v44 = vpop.f32.mrf.mxu3 }
  0xb8   : > { %v464_v47 = vadd.f32 %v463_v43, %v396_v40  ;;  %v483_v48 = vadd.f32 %v482_v44, %v415_v41  ;;  %v559_v13 = vadd.f32 %v553_v1, %v551_v6  ;;  %v568_v14 = vadd.f32 %v554_v2, %v552_v7 }
  0xba   : > { %v515_v51 = vadd.f32 %v504_v34, %v464_v47  ;;  %v516_v52 = vadd.f32 %v504_v34, %v483_v48  ;;  %v578_v34 = vstv %s577_s21  ;;  %v591_v48 = vunpack.c.l.bf16 %v1034_v5  ;;  %s858_s21 = scalar_lea.hbm %s1119_s7, 8 }
  0xbb   : > { %p860_p2 = scmp.lt.s32.totalorder %s858_s21, %s854_s29 }
  0xbc   : > { %v523_v59 = vmax.f32 %v515_v51, 0.0  ;;  %v524_v60 = vmax.f32 %v516_v52, 0.0 }
  0xbd   : > { %v398_v61 = vpop.f32.mrf.mxu0  ;;  %v417_v62 = vpop.f32.mrf.mxu1  ;;  %p861_p3 = por %p860_p2, %p859_p1 }
  0xbe   : > { %v555_v9 = vmul.f32 %v544_v8, %v523_v59  ;;  %v556_v10 = vmul.f32 %v544_v8, %v524_v60 }
  0xbf   : > { %v465_v63 = vpop.f32.mrf.mxu2  ;;  %v484_v0 = vpop.f32.mrf.mxu3  ;;  %p862_p5 = pnand %p861_p3, %p857_p0 }
  0xc0   : > { %v466_v3 = vadd.f32 %v465_v63, %v398_v61  ;;  %v485_v4 = vadd.f32 %v484_v0, %v417_v62  ;;  %v560_v18 = vadd.f32 %v559_v13, %v555_v9  ;;  %v569_v19 = vadd.f32 %v568_v14, %v556_v10 }
  0xc2   : > { %v517_v11 = vadd.f32 %v509_v53, %v466_v3  ;;  %v518_v12 = vadd.f32 %v509_v53, %v485_v4 }
  0xc4   : > { %v525_v15 = vmax.f32 %v517_v11, 0.0  ;;  %v526_v16 = vmax.f32 %v518_v12, 0.0 }
  0xc6   : > { %v557_v20 = vmul.f32 %v549_v17, %v525_v15  ;;  %v558_v21 = vmul.f32 %v549_v17, %v526_v16 }
  0xc8   : > { %v561_v22 = vadd.f32 %v560_v18, %v557_v20  ;;  %v570_v23 = vadd.f32 %v569_v19, %v558_v21 }
  0xca   : > { %v562_v24 = vrot.slane %v561_v22, 4  ;;  %v571_v25 = vrot.slane %v570_v23, 4 }
  0xcc   : > { %v563_v26 = vadd.f32 %v562_v24, %v561_v22  ;;  %v572_v27 = vadd.f32 %v571_v25, %v570_v23 }
  0xce   : > { %v564_v28 = vrot.slane %v563_v26, 2  ;;  %v573_v29 = vrot.slane %v572_v27, 2 }
  0xd0   : > { %v565_v30 = vadd.f32 %v564_v28, %v563_v26  ;;  %v574_v31 = vadd.f32 %v573_v29, %v572_v27 }
  0xd2   : > { %v566_v32 = vrot.slane %v565_v30, 1  ;;  %v575_v33 = vrot.slane %v574_v31, 1 }
  0xd4   : > { %v567_v35 = vadd.f32 %v566_v32, %v565_v30  ;;  %v576_v36 = vadd.f32 %v575_v33, %v574_v31 }
  0xd6   : > { %v579_v37 = vadd.f32 %v578_v34, %v567_v35  ;;  %v580_v38 = vadd.f32 %v578_v34, %v576_v36 }
  0xd8   : > { %v581_v39 = vsub.f32 0.0, %v579_v37  ;;  %v582_v40 = vsub.f32 0.0, %v580_v38 }
  0xda   : > { %v583_v41 = vmul.f32 1.442695, %v581_v39  ;;  %v585_v42 = vmul.f32 1.442695, %v582_v40 }
  0xdc   : > { %830 = vpow2.f32 %v583_v41 }
  0xdd   : > { %832 = vpow2.f32 %v585_v42 }
  0xe2   : > { %v831_v43 = vpop.eup %830 }
  0xe3   : > { %v833_v44 = vpop.eup %832  ;;  %v587_v45 = vadd.f32 1.0, %v831_v43 }
  0xe4   : > { %v588_v46 = vadd.f32 1.0, %v833_v44 }
  0xe6   : > { %834 = vrcp.f32 %v588_v46 }
  0xe7   : > { %836 = vrcp.f32 %v587_v45 }
  0xec   : > { %v835_v47 = vpop.eup %834 }
  0xed   : > { %v594_v49 = vrot.slane %v835_v47, 4  ;;  %v837_v50 = vpop.eup %836 }
  0xef   : > { %v595_v51 = vsel %vm442_vm0, %v837_v50, %v594_v49 }
  0xf0   : > { %v597_v52 = vmul.f32 %v595_v51, %v591_v48 }
  0xf2   : > { %599 = vst [vmem:[#allocation1] ss:$2 sm:$0xff] %v597_v52 }
  0xf9   : > { %v600_v53 = vld.sshfl [vmem:[#allocation1] sm:$0xff pattern:$0x75316420]  ;;  %v601_v54 = vld.sshfl [vmem:[#allocation1 + $0x8] sm:$0xff pattern:$0x75316420] }
  0xfa   : > { %v604_v55 = vpack.c.bf16 %v601_v54, %v600_v53 }
  0xfc   : > { %v606_v5 = vrot.slane %v604_v55, 2 }
  0xfe   : > { %v609_v56 = vsel %vm377_vm2, %v604_v55, %v606_v5 }
  0xff   : > { %611 = vst [vmem:[%s323_s11] sm:$0xf] %v609_v56 }
 0x100   : > { %865 = shalt.err (!%p862_p5)
}
 0x101   : > { %771 = dma.vmem_to_hbm [thread:$0]  (%p1002_p4), %s629_s13, 64, %s631_s16, %s613_s17  }
 0x102 PF: > { %p777_p6 = scmp.ge.s32.totalorder %s916_s8, 2  ;;  %s642_s22 = sand.u32 1, %s896_s26  }
 0x103   : > { %s643_s25 = scalar_lea.sflag [#allocation4], %s642_s22 }
 0x104   : > { %p774_p7 = pnand %p777_p6, %p1009_p8 }
 0x106   : > { %p775_p9 = pneg %p774_p7 }
 0x108   : > { %891 = dma.done.wait (%p775_p9), %s643_s25, 64  }
 0x109   : > { %893 = vsyncadd (%p775_p9), %s643_s25, 4294967232  ;;  %s21_s8 = sadd.s32 1, %s916_s8   ;;  %s1122_s26 = smov %s900_s27 }
 0x10a   : > { %p18_p10 = scmp.ge.s32.totalorder %s21_s8, 4   ;;  %s1123_s27 = smov %s904_s28 }
 0x10b   : > { %s1124_s28 = smov %s1015_s15  ;;  %s1125_s29 = smov %s912_s30 }
 0x10c   : > { %s1126_s30 = smov %s1128_s10  ;;  %20 = sbr.rel (!%p18_p10) target bundleno = 6 (0x6), region = 86 }
 0x111   :  { %649 = vsyncpa [#allocation4], 1 }
 0x112   :  { %651 = vsyncpa [#allocation4 + $0x1], 1 }

</bundles_post_ra>
